<compile_context>
chip_gen: v5e
topology: v5e:2x2
jax: 0.10.0
libtpu: 0.0.40
codegen_flags: <defaults>
</compile_context>

<pallas_src>
import functools

import jax
import jax.numpy as jnp
from jax import lax
from jax.experimental import pallas as pl
from jax.experimental.pallas import tpu as pltpu


def _round_up(x, m):
    return (x + m - 1) // m * m


def _adj_kernel(cstart_ref, ccount_ref, dst_ref, src_ref, adj_ref, *, tk_sub):
    # cstart_ref/ccount_ref : SMEM [n_row_tiles] int32 — first edge-chunk index and
    #                         chunk count for each dst (row) tile (scalar prefetch).
    # dst_ref/src_ref       : VMEM-resident [n_chunks, 1, tk_sub] int32 kept-edge
    #                         endpoints, -1 = padding sentinel, fetched once for the grid.
    # adj_ref               : [tn, tn] f32 output tile; rows = dst node, cols = src node.
    i = pl.program_id(0)
    j = pl.program_id(1)
    tn = adj_ref.shape[0]

    adj_ref[...] = jnp.zeros_like(adj_ref)

    c0 = cstart_ref[i]          # first chunk holding edges with dst in row tile i
    nc = ccount_ref[i]          # number of chunks to visit (0 if this tile has no edges)

    i_off = i * tn
    j_off = j * tn
    # Hoisted once; reused by every loop iteration (JAX does not CSE broadcasts).
    row_iota = lax.broadcasted_iota(jnp.int32, (tn, tk_sub), 0)

    def body(c, carry):
        # Dynamic leading-axis load of one [1, tk_sub] edge chunk (already in VMEM).
        d = dst_ref[c0 + c] - i_off            # tile offset applied to the small
        s = src_ref[c0 + c] - j_off            # [1, tk] operand, not the [tn, tk] slab
        # One-hot slabs built directly in transposed [node, edge] layout -> NT MXU
        # matmul, no XLU transpose.  Sentinels / out-of-tile ids give all-zero columns,
        # so chunk-boundary overlap from dst-sorted pruning is harmless.
        D = (d == row_iota).astype(jnp.bfloat16)       # [tn, tk_sub], rows = dst-tile i
        S = (s == row_iota).astype(jnp.bfloat16)       # [tn, tk_sub], rows = src-tile j
        # counts[dst, src] — NT matmul (contract lane dims), f32 accumulation on MXU,
        # accumulated straight into the VMEM-resident output tile.
        adj_ref[...] += lax.dot_general(
            D, S, dimension_numbers=(((1,), (1,)), ((), ())),
            preferred_element_type=jnp.float32)
        return carry

    # dst-sorted pruning: row tile i only visits its own contiguous chunk range.
    lax.fori_loop(0, nc, body, 0)

    # add_self_loops: identity contribution exists only on diagonal output tiles.
    @pl.when(i == j)
    def _():
        r = lax.broadcasted_iota(jnp.int32, (tn, tn), 0)
        c = lax.broadcasted_iota(jnp.int32, (tn, tn), 1)
        adj_ref[...] += (r == c).astype(jnp.float32)

    # Clamp duplicates (parallel edges / pre-existing self loops) to 1.
    adj_ref[...] = jnp.minimum(adj_ref[...], 1.0)


def _build_adj(kept, num_nodes, *, tn=256, tk_sub=512):
    """Dense [N, N] binary adjacency (adj[dst, src]=1, plus self loops) via Pallas."""
    num_keep = kept.shape[0]
    # TODO(synk): per-generation tuning — tn=128 matches v5e's 4x128x128 MXU; 256 is the
    # sweet spot for v6e/v7x's 2x256x256 MXU and is the default here.  For very small N
    # (single output tile) v7x's second TensorCore idles; a k-split per core would fix it.
    tn = min(tn, _round_up(max(num_nodes, 1), 128))
    n_pad = _round_up(max(num_nodes, 1), tn)
    n_tiles = n_pad // tn
    e_pad = _round_up(max(num_keep, 1), tk_sub)
    n_chunks = e_pad // tk_sub

    # Sort kept edges by dst so each row tile's edges form one contiguous chunk range.
    dst = kept[:, 1].astype(jnp.int32)
    order = jnp.argsort(dst)
    dst_s = jnp.take(dst, order)
    src_s = jnp.take(kept[:, 0].astype(jnp.int32), order)

    # -1 padding sentinels never match a (non-negative) local node id.
    dst_flat = jnp.full((e_pad,), -1, jnp.int32).at[:num_keep].set(dst_s)
    src_flat = jnp.full((e_pad,), -1, jnp.int32).at[:num_keep].set(src_s)
    dst_chunks = dst_flat.reshape(n_chunks, 1, tk_sub)
    src_chunks = src_flat.reshape(n_chunks, 1, tk_sub)

    # Per-row-tile chunk ranges (scalar prefetch -> SMEM).  O(E log E) argsort in the
    # wrapper is negligible next to the kernel's MXU work.
    bounds = jnp.arange(n_tiles + 1, dtype=jnp.int32) * tn
    start_e = jnp.searchsorted(dst_s, bounds[:-1], side="left").astype(jnp.int32)
    end_e = jnp.searchsorted(dst_s, bounds[1:], side="left").astype(jnp.int32)
    chunk_start = (start_e // tk_sub).astype(jnp.int32)
    chunk_count = jnp.where(
        end_e > start_e, (end_e - 1) // tk_sub + 1 - chunk_start, 0
    ).astype(jnp.int32)

    # TODO(synk): for very large E on v7x (64 MiB VMEM) the whole-edge-row residency
    # should be chunked; for typical graph sizes it is a few hundred KiB.
    adj_p = pl.pallas_call(
        functools.partial(_adj_kernel, tk_sub=tk_sub),
        out_shape=jax.ShapeDtypeStruct((n_pad, n_pad), jnp.float32),
        grid_spec=pltpu.PrefetchScalarGridSpec(
            num_scalar_prefetch=2,
            grid=(n_tiles, n_tiles),
            in_specs=[
                # Whole edge arrays, constant block index -> DMA'd once, VMEM-resident
                # for the entire grid (no per-(i,j) tiny DMAs).
                pl.BlockSpec((n_chunks, 1, tk_sub), lambda i, j, *_: (0, 0, 0)),
                pl.BlockSpec((n_chunks, 1, tk_sub), lambda i, j, *_: (0, 0, 0)),
            ],
            out_specs=pl.BlockSpec((tn, tn), lambda i, j, *_: (i, j)),
        ),
        compiler_params=pltpu.CompilerParams(
            dimension_semantics=("parallel", "parallel")),
    )(chunk_start, chunk_count, dst_chunks, src_chunks)
    return adj_p[:num_nodes, :num_nodes]


def maskdm_edge(edge_index, *, p=0.7, num_nodes, key):
    """JAX/Pallas port of MaskdmEdge.forward for an [E, 2] int edge_index."""
    edge_index = edge_index.astype(jnp.int32)

    # to_undirected: concat original edges with reversed edges.
    # TODO(synk): torch_geometric.to_undirected also coalesces (sorts + dedups) duplicates.
    rev = edge_index[:, ::-1]
    all_edges = jnp.concatenate([edge_index, rev], axis=0)        # [E_total, 2]
    num_edge = all_edges.shape[0]

    mask_num = int(num_edge * p)
    num_keep = num_edge - mask_num

    # np.random.shuffle replaced by a deterministic jax permutation.
    perm = jax.random.permutation(key, num_edge)
    keep_idx = perm[:num_keep].astype(jnp.int32)
    mask_idx = perm[num_keep:].astype(jnp.int32)

    # Cheap O(E) gathers stay in plain JAX (no in-kernel one-hot gather matmuls).
    kept = jnp.take(all_edges, keep_idx, axis=0)                  # [E_keep, 2]
    edge_index_mask = jnp.take(all_edges, mask_idx, axis=0)       # [E_mask, 2]

    # add_self_loops on the transposed kept edges.
    loops = jnp.arange(num_nodes, dtype=jnp.int32)
    edge_index_out = jnp.concatenate(
        [kept.T, jnp.stack([loops, loops], axis=0)], axis=1)      # [2, E_keep + N]

    # TODO(synk): torch_sparse.SparseTensor has no Pallas equivalent; returning dense
    # [N, N] f32 (binary values; could be emitted as bf16/int8 to cut HBM writeback).
    adj = _build_adj(kept, num_nodes)

    return edge_index_out, adj, edge_index_mask


if __name__ == "__main__":
    key = jax.random.PRNGKey(0)
    k_edges, k_perm = jax.random.split(key)

    N = 16          # num_nodes
    E = 24          # directed input edges -> 48 after to_undirected concat
    edge_index = jax.random.randint(k_edges, (E, 2), 0, N, dtype=jnp.int32)

    ei, adj, ei_mask = maskdm_edge(edge_index, p=0.7, num_nodes=N, key=k_perm)
    jax.block_until_ready((ei, adj, ei_mask))

    num_edge = 2 * E
    mask_num = int(num_edge * 0.7)
    num_keep = num_edge - mask_num

    # shape checks
    assert ei.shape == (2, num_keep + N)
    assert adj.shape == (N, N)
    assert ei_mask.shape == (mask_num, 2)

    # every returned edge (incl. self loops) is present in adj
    s, d = ei[0], ei[1]
    assert bool(jnp.all(adj[d, s] == 1.0))

    # adj matches a pure-JAX reference built from the kept edges + self loops
    kept_t = ei[:, :num_keep]
    ref = jnp.zeros((N, N), jnp.float32).at[kept_t[1], kept_t[0]].set(1.0)
    ref = jnp.maximum(ref, jnp.eye(N, dtype=jnp.float32))
    assert bool(jnp.all(adj == ref))

    print("KERNEL_OK")
</pallas_src>

<mosaic_0001>
module attributes {stable_mosaic.version = 11 : i64} {
  func.func @_adj_kernel(%arg0: i32, %arg1: i32, %arg2: memref<1xi32, #tpu.memory_space<smem>>, %arg3: memref<1xi32, #tpu.memory_space<smem>>, %arg4: memref<1x1x512xi32, #tpu.memory_space<vmem>>, %arg5: memref<1x1x512xi32, #tpu.memory_space<vmem>>, %arg6: memref<128x128xf32, #tpu.memory_space<vmem>>) attributes {dimension_semantics = [#tpu.dimension_semantics<parallel>, #tpu.dimension_semantics<parallel>], iteration_bounds = array<i64: 1, 1>, scalar_prefetch = 2 : i64, scratch_operands = 0 : i64, tpu.core_type = #tpu.core_type<tc>, window_params = [{pipeline_mode = #tpu.pipeline_mode<synchronous>, transform_indices = @transform_0, window_bounds = array<i64: 1, 1, 512>}, {pipeline_mode = #tpu.pipeline_mode<synchronous>, transform_indices = @transform_1, window_bounds = array<i64: 1, 1, 512>}, {transform_indices = @transform_2, window_bounds = array<i64: 128, 128>}]} {
    %cst = arith.constant 0.000000e+00 : f32
    %0 = vector.broadcast %cst : f32 to vector<128x128xf32>
    %c0 = arith.constant 0 : index
    %c0_0 = arith.constant 0 : index
    %1 = vector.load %arg6[%c0, %c0_0] : memref<128x128xf32, #tpu.memory_space<vmem>>, vector<128x128xf32>
    tpu.vector_store %arg6[%c0, %c0_0], %0 {strides = array<i32>} : memref<128x128xf32, #tpu.memory_space<vmem>>, vector<128x128xf32>,
    %2 = arith.index_cast %arg0 : i32 to index
    %3 = memref.load %arg2[%2] : memref<1xi32, #tpu.memory_space<smem>>
    %4 = arith.index_cast %arg0 : i32 to index
    %5 = memref.load %arg3[%4] : memref<1xi32, #tpu.memory_space<smem>>
    %c128_i32 = arith.constant 128 : i32
    %6 = arith.muli %arg0, %c128_i32 : i32
    %c128_i32_1 = arith.constant 128 : i32
    %7 = arith.muli %arg1, %c128_i32_1 : i32
    %8 = tpu.iota {dimensions = array<i32: 0>} : vector<128x512xi32>
    %c0_i32 = arith.constant 0 : i32
    %c0_i32_2 = arith.constant 0 : i32
    %9 = arith.subi %5, %c0_i32_2 : i32
    %10 = arith.addi %c0_i32_2, %9 : i32
    %c1_i32 = arith.constant 1 : i32
    scf.for %arg7 = %c0_i32_2 to %10 step %c1_i32  : i32 {
      %18 = arith.addi %3, %arg7 : i32
      %19 = arith.index_cast %18 : i32 to index
      %c0_9 = arith.constant 0 : index
      %c0_10 = arith.constant 0 : index
      %20 = vector.load %arg4[%19, %c0_9, %c0_10] : memref<1x1x512xi32, #tpu.memory_space<vmem>>, vector<1x1x512xi32>
      %21 = vector.shape_cast %20 : vector<1x1x512xi32> to vector<1x512xi32>
      %22 = vector.broadcast %6 : i32 to vector<1x512xi32>
      %23 = arith.subi %21, %22 : vector<1x512xi32>
      %24 = arith.addi %3, %arg7 : i32
      %25 = arith.index_cast %24 : i32 to index
      %c0_11 = arith.constant 0 : index
      %c0_12 = arith.constant 0 : index
      %26 = vector.load %arg5[%25, %c0_11, %c0_12] : memref<1x1x512xi32, #tpu.memory_space<vmem>>, vector<1x1x512xi32>
      %27 = vector.shape_cast %26 : vector<1x1x512xi32> to vector<1x512xi32>
      %28 = vector.broadcast %7 : i32 to vector<1x512xi32>
      %29 = arith.subi %27, %28 : vector<1x512xi32>
      %30 = vector.broadcast %23 : vector<1x512xi32> to vector<128x512xi32>
      %31 = arith.cmpi eq, %30, %8 : vector<128x512xi32>
      %32 = arith.extui %31 : vector<128x512xi1> to vector<128x512xi32>
      %33 = arith.sitofp %32 : vector<128x512xi32> to vector<128x512xf32>
      %34 = arith.truncf %33 : vector<128x512xf32> to vector<128x512xbf16>
      %35 = vector.broadcast %29 : vector<1x512xi32> to vector<128x512xi32>
      %36 = arith.cmpi eq, %35, %8 : vector<128x512xi32>
      %37 = arith.extui %36 : vector<128x512xi1> to vector<128x512xi32>
      %38 = arith.sitofp %37 : vector<128x512xi32> to vector<128x512xf32>
      %39 = arith.truncf %38 : vector<128x512xf32> to vector<128x512xbf16>
      %c0_13 = arith.constant 0 : index
      %c0_14 = arith.constant 0 : index
      %40 = vector.load %arg6[%c0_13, %c0_14] : memref<128x128xf32, #tpu.memory_space<vmem>>, vector<128x128xf32>
      %cst_15 = arith.constant dense<0.000000e+00> : vector<128x128xf32>
      %41 = tpu.matmul %34, %39, %cst_15 {dimension_numbers = #tpu.dot_dimension_numbers<[1], [1], [0], [0], [0, 0, 1, 0], [], []>} : vector<128x512xbf16>, vector<128x512xbf16>, vector<128x128xf32> -> vector<128x128xf32>
      %42 = arith.addf %40, %41 : vector<128x128xf32>
      %c0_16 = arith.constant 0 : index
      %c0_17 = arith.constant 0 : index
      %43 = vector.load %arg6[%c0_16, %c0_17] : memref<128x128xf32, #tpu.memory_space<vmem>>, vector<128x128xf32>
      tpu.vector_store %arg6[%c0_16, %c0_17], %42 {strides = array<i32>} : memref<128x128xf32, #tpu.memory_space<vmem>>, vector<128x128xf32>,
    }
    %11 = arith.cmpi eq, %arg0, %arg1 : i32
    %12 = arith.extui %11 : i1 to i32
    %c0_i32_3 = arith.constant 0 : i32
    %13 = arith.cmpi ne, %12, %c0_i32_3 : i32
    scf.if %13 {
      %18 = tpu.iota {dimensions = array<i32: 0>} : vector<128x128xi32>
      %19 = tpu.iota {dimensions = array<i32: 1>} : vector<128x128xi32>
      %c0_9 = arith.constant 0 : index
      %c0_10 = arith.constant 0 : index
      %20 = vector.load %arg6[%c0_9, %c0_10] : memref<128x128xf32, #tpu.memory_space<vmem>>, vector<128x128xf32>
      %21 = arith.cmpi eq, %18, %19 : vector<128x128xi32>
      %22 = arith.extui %21 : vector<128x128xi1> to vector<128x128xi32>
      %23 = arith.sitofp %22 : vector<128x128xi32> to vector<128x128xf32>
      %24 = arith.addf %20, %23 : vector<128x128xf32>
      %c0_11 = arith.constant 0 : index
      %c0_12 = arith.constant 0 : index
      %25 = vector.load %arg6[%c0_11, %c0_12] : memref<128x128xf32, #tpu.memory_space<vmem>>, vector<128x128xf32>
      tpu.vector_store %arg6[%c0_11, %c0_12], %24 {strides = array<i32>} : memref<128x128xf32, #tpu.memory_space<vmem>>, vector<128x128xf32>,
    } else {
    }
    %c0_4 = arith.constant 0 : index
    %c0_5 = arith.constant 0 : index
    %14 = vector.load %arg6[%c0_4, %c0_5] : memref<128x128xf32, #tpu.memory_space<vmem>>, vector<128x128xf32>
    %cst_6 = arith.constant 1.000000e+00 : f32
    %15 = vector.broadcast %cst_6 : f32 to vector<128x128xf32>
    %16 = arith.minimumf %14, %15 : vector<128x128xf32>
    %c0_7 = arith.constant 0 : index
    %c0_8 = arith.constant 0 : index
    %17 = vector.load %arg6[%c0_7, %c0_8] : memref<128x128xf32, #tpu.memory_space<vmem>>, vector<128x128xf32>
    tpu.vector_store %arg6[%c0_7, %c0_8], %16 {strides = array<i32>} : memref<128x128xf32, #tpu.memory_space<vmem>>, vector<128x128xf32>,
    return
  }
  func.func @transform_0(%arg0: i32, %arg1: i32, %arg2: memref<1xi32, #tpu.memory_space<smem>>, %arg3: memref<1xi32, #tpu.memory_space<smem>>) -> (i32, i32, i32) {
    %c0_i32 = arith.constant 0 : i32
    %c0_i32_0 = arith.constant 0 : i32
    %c0_i32_1 = arith.constant 0 : i32
    %c0_i32_2 = arith.constant 0 : i32
    return %c0_i32, %c0_i32_0, %c0_i32_1 : i32, i32, i32
  }
  func.func @transform_1(%arg0: i32, %arg1: i32, %arg2: memref<1xi32, #tpu.memory_space<smem>>, %arg3: memref<1xi32, #tpu.memory_space<smem>>) -> (i32, i32, i32) {
    %c0_i32 = arith.constant 0 : i32
    %c0_i32_0 = arith.constant 0 : i32
    %c0_i32_1 = arith.constant 0 : i32
    %c0_i32_2 = arith.constant 0 : i32
    return %c0_i32, %c0_i32_0, %c0_i32_1 : i32, i32, i32
  }
  func.func @transform_2(%arg0: i32, %arg1: i32, %arg2: memref<1xi32, #tpu.memory_space<smem>>, %arg3: memref<1xi32, #tpu.memory_space<smem>>) -> (i32, i32) {
    %c0_i32 = arith.constant 0 : i32
    return %arg0, %arg1 : i32, i32
  }
}

</mosaic_0001>

<bundles_post_ra>
// kernel: tpu_custom_call.1
= control target key start
LH: loop header
LB: loop body
LE: loop exit
PB: predicated region body
PF: predicated region fallthrough
CT: control target
= control target key end

     0   :  { %11 = vsyncpa [#allocation6], 0  ;;  %s1833_s0 = inlined_call_operand.<no memory space> [shape: s32[1], index: 0, kind: input, shape index: {}]   ;;  %s1834_s1 = inlined_call_operand.<no memory space> [shape: s32[1], index: 1, kind: input, shape index: {}]   ;;  %s1835_s2 = inlined_call_operand.vmem [shape: s32[1,1,512], index: 2, kind: input, shape index: {}]   ;;  %s1836_s3 = inlined_call_operand.hbm [shape: s32[1,1,512], index: 3, kind: input, shape index: {}]   ;;  %s1837_s4 = inlined_call_operand.hbm [shape: f32[128,128], index: 4, kind: output, shape index: {}]  }
   0x1   :  { %12 = vsyncpa [#allocation7], 0  ;;  %s20_s17 = sshll.u32 %s1836_s3, 4  ;;  %s1311_s18 = smov [#allocation5]   ;;  %s21_s17 = int_to_ptr.hbm [resolvable:$true] %s20_s17 }
   0x2   :  { %s22_s19 = sshll.u32 %s1311_s18, 4  ;;  %s23_s19 = int_to_ptr.vmem [resolvable:$true] %s22_s19 }
   0x3   :  { %25 = dma.hbm_to_vmem [thread:$0]  %s21_s17, 64, %s23_s19, [#allocation6]  }
   0x4   :  { %1303 = dma.done.wait [#allocation6], 64  }
   0x5   :  { %1304 = vsyncadd [#allocation6], 4294967232  ;;  %v50_v0 = vlaneseq  ;;  %v1312_v1 = vmov 0.0   ;;  %p963_p0 = scmp.le.s32.totalorder %s1834_s1, 0 }
   0x6   :  { %30 = vst [vmem:[#allocation8] sm:$0xff] %v1312_v1  ;;  %s1412_s21 = smov (!%p963_p0), 0  }
   0x7   :  { %31 = vst [vmem:[#allocation8 + $0x8] sm:$0xff] %v1312_v1  ;;  %v1348_v2 = vshrl.u32 %v50_v0, 7 }
   0x8   :  { %32 = vst [vmem:[#allocation8 + $0x10] sm:$0xff] %v1312_v1 }
   0x9   :  { %33 = vst [vmem:[#allocation8 + $0x18] sm:$0xff] %v1312_v1  ;;  %v1353_v3 = vadd.s32 8, %v1348_v2  ;;  %v1356_v4 = vadd.s32 16, %v1348_v2  ;;  %v1359_v5 = vadd.s32 24, %v1348_v2  ;;  %v1362_v6 = vadd.s32 32, %v1348_v2 }
   0xa   :  { %34 = vst [vmem:[#allocation8 + $0x20] sm:$0xff] %v1312_v1  ;;  %v1366_v7 = vadd.s32 40, %v1348_v2  ;;  %v1369_v8 = vadd.s32 48, %v1348_v2  ;;  %v1372_v9 = vadd.s32 56, %v1348_v2  ;;  %v1375_v10 = vadd.s32 64, %v1348_v2 }
   0xb   :  { %35 = vst [vmem:[#allocation8 + $0x28] sm:$0xff] %v1312_v1  ;;  %v1379_v11 = vadd.s32 72, %v1348_v2  ;;  %v1382_v12 = vadd.s32 80, %v1348_v2  ;;  %v1385_v13 = vadd.s32 88, %v1348_v2  ;;  %v1388_v14 = vadd.s32 96, %v1348_v2 }
   0xc   :  { %36 = vst [vmem:[#allocation8 + $0x30] sm:$0xff] %v1312_v1  ;;  %v1392_v15 = vadd.s32 104, %v1348_v2  ;;  %v1395_v16 = vadd.s32 112, %v1348_v2  ;;  %v1398_v17 = vadd.s32 120, %v1348_v2 }
   0xd   :  { %37 = vst [vmem:[#allocation8 + $0x38] sm:$0xff] %v1312_v1 }
   0xe   :  { %38 = vst [vmem:[#allocation8 + $0x40] sm:$0xff] %v1312_v1 }
   0xf   :  { %39 = vst [vmem:[#allocation8 + $0x48] sm:$0xff] %v1312_v1 }
  0x10   :  { %40 = vst [vmem:[#allocation8 + $0x50] sm:$0xff] %v1312_v1 }
  0x11   :  { %41 = vst [vmem:[#allocation8 + $0x58] sm:$0xff] %v1312_v1  ;;  %960 = sbr.rel (%p963_p0) target bundleno = 354 (0x162), region = 39 }
  0x12   :  { %42 = vst [vmem:[#allocation8 + $0x60] sm:$0xff] %v1312_v1 }
  0x13   :  { %43 = vst [vmem:[#allocation8 + $0x68] sm:$0xff] %v1312_v1 }
  0x14   :  { %44 = vst [vmem:[#allocation8 + $0x70] sm:$0xff] %v1312_v1 }
  0x15   :  { %45 = vst [vmem:[#allocation8 + $0x78] sm:$0xff] %v1312_v1 }
  0x16 LB: > { %s73_s24 = sadd.s32 %s1309_s21, %s1833_s0  ;;  %v1313_v23 = vmov 1.0|1.0   ;;  %v539_v37 = vld [vmem:[#allocation8] sm:$0xff]  ;;  %v540_v46 = vld [vmem:[#allocation8 + $0x8] sm:$0xff]  ;;  %v541_v55 = vld [vmem:[#allocation8 + $0x10] sm:$0xff]  ;;  %s70_s21 = sadd.s32 1, %s1309_s21   ;;  %s1309_s21 = sphi %s1412_s21, %s70_s21  }
  0x17   : > { %s1421_s25 = sshll.u32 %s73_s24, 2  ;;  %p69_p1 = scmp.ge.s32.totalorder %s70_s21, %s1834_s1 }
  0x18   : > { %s79_s26 = scalar_lea.vmem [#allocation5], %s1421_s25  ;;  %s75_s29 = scalar_lea.vmem %s1835_s2, %s1421_s25 }
  0x19   : > { %v80_v18 = vld [vmem:[%s79_s26] sm:$0xf] }
  0x1a   : > { %v1424_v19 = vperm.slane %v80_v18, 0  ;;  %v1426_v20 = vperm.slane %v80_v18, 1  ;;  %v1428_v21 = vperm.slane %v80_v18, 2  ;;  %v1430_v22 = vperm.slane %v80_v18, 3  ;;  %v76_v24 = vld [vmem:[%s75_s29] sm:$0xf] }
  0x1b   : > { %v1592_v25 = vperm.slane %v76_v24, 0  ;;  %v1594_v26 = vperm.slane %v76_v24, 1  ;;  %v1596_v27 = vperm.slane %v76_v24, 2  ;;  %v1599_v28 = vperm.slane %v76_v24, 3  ;;  %v542_v18 = vld [vmem:[#allocation8 + $0x18] sm:$0xff] }
  0x1c   : > { %vm371_vm0 = vcmp.eq.s32.totalorder %v1424_v19, %v1395_v16  ;;  %vm375_vm1 = vcmp.eq.s32.totalorder %v1424_v19, %v1398_v17  ;;  %vm372_vm2 = vcmp.eq.s32.totalorder %v1426_v20, %v1395_v16  ;;  %vm376_vm3 = vcmp.eq.s32.totalorder %v1426_v20, %v1398_v17 }
  0x1d   : > { %vm1093_vm4 = vmpackc.low %vm375_vm1, %vm371_vm0  ;;  %vm373_vm5 = vcmp.eq.s32.totalorder %v1428_v21, %v1395_v16  ;;  %vm377_vm6 = vcmp.eq.s32.totalorder %v1428_v21, %v1398_v17  ;;  %vm374_vm7 = vcmp.eq.s32.totalorder %v1430_v22, %v1395_v16  ;;  %vm378_vm8 = vcmp.eq.s32.totalorder %v1430_v22, %v1398_v17 }
  0x1e   : > { %1094 = vmatpush.bf16.xpose.msk.msra.mxu0 %vm1093_vm4, %v1313_v23  ;;  %vm1125_vm9 = vmpackc.low %vm376_vm3, %vm372_vm2  ;;  %vm363_vm12 = vcmp.eq.s32.totalorder %v1424_v19, %v1388_v14  ;;  %vm367_vm13 = vcmp.eq.s32.totalorder %v1424_v19, %v1392_v15  ;;  %vm364_vm14 = vcmp.eq.s32.totalorder %v1426_v20, %v1388_v14  ;;  %vm368_vm15 = vcmp.eq.s32.totalorder %v1426_v20, %v1392_v15 }
  0x1f   : > { %1126 = vmatpush.bf16.xpose.msk.msra.mxu1 %vm1125_vm9, %v1313_v23  ;;  %vm1157_vm10 = vmpackc.low %vm377_vm6, %vm373_vm5  ;;  %vm365_vm0 = vcmp.eq.s32.totalorder %v1428_v21, %v1388_v14  ;;  %vm369_vm1 = vcmp.eq.s32.totalorder %v1428_v21, %v1392_v15  ;;  %vm366_vm3 = vcmp.eq.s32.totalorder %v1430_v22, %v1388_v14  ;;  %vm370_vm4 = vcmp.eq.s32.totalorder %v1430_v22, %v1392_v15 }
  0x20   : > { %1158 = vmatpush.bf16.xpose.msk.msra.mxu2 %vm1157_vm10, %v1313_v23  ;;  %vm1189_vm11 = vmpackc.low %vm378_vm8, %vm374_vm7  ;;  %vm355_vm8 = vcmp.eq.s32.totalorder %v1424_v19, %v1382_v12  ;;  %vm359_vm9 = vcmp.eq.s32.totalorder %v1424_v19, %v1385_v13  ;;  %vm356_vm10 = vcmp.eq.s32.totalorder %v1426_v20, %v1382_v12 }
  0x21   : > { %1190 = vmatpush.bf16.xpose.msk.msra.mxu3 %vm1189_vm11, %v1313_v23  ;;  %vm1095_vm2 = vmpackc.low %vm367_vm13, %vm363_vm12  ;;  %vm360_vm11 = vcmp.eq.s32.totalorder %v1426_v20, %v1385_v13  ;;  %vm357_vm12 = vcmp.eq.s32.totalorder %v1428_v21, %v1382_v12  ;;  %vm361_vm13 = vcmp.eq.s32.totalorder %v1428_v21, %v1385_v13 }
  0x22   : > { %vm1127_vm5 = vmpackc.low %vm368_vm15, %vm364_vm14  ;;  %vm358_vm15 = vcmp.eq.s32.totalorder %v1430_v22, %v1382_v12 }
  0x23   : > { %vm1159_vm6 = vmpackc.low %vm369_vm1, %vm365_vm0  ;;  %vm362_vm0 = vcmp.eq.s32.totalorder %v1430_v22, %v1385_v13 }
  0x24   : > { %vm1191_vm7 = vmpackc.low %vm370_vm4, %vm366_vm3  ;;  %vm347_vm4 = vcmp.eq.s32.totalorder %v1424_v19, %v1375_v10 }
  0x25   : > { %vm1097_vm14 = vmpackc.low %vm359_vm9, %vm355_vm8  ;;  %vm349_vm8 = vcmp.eq.s32.totalorder %v1428_v21, %v1375_v10  ;;  %vm353_vm9 = vcmp.eq.s32.totalorder %v1428_v21, %v1379_v11 }
  0x26   : > { %1096 = vmatpush.bf16.xpose.msk.msra.mxu0 %vm1095_vm2, %v1313_v23  ;;  %vm1129_vm1 = vmpackc.low %vm360_vm11, %vm356_vm10  ;;  %vm350_vm11 = vcmp.eq.s32.totalorder %v1430_v22, %v1375_v10 }
  0x27   : > { %1128 = vmatpush.bf16.xpose.msk.msra.mxu1 %vm1127_vm5, %v1313_v23  ;;  %vm1161_vm2 = vmpackc.low %vm361_vm13, %vm357_vm12  ;;  %vm351_vm5 = vcmp.eq.s32.totalorder %v1424_v19, %v1379_v11  ;;  %vm354_vm12 = vcmp.eq.s32.totalorder %v1430_v22, %v1379_v11 }
  0x28   : > { %1160 = vmatpush.bf16.xpose.msk.msra.mxu2 %vm1159_vm6, %v1313_v23  ;;  %vm1193_vm3 = vmpackc.low %vm362_vm0, %vm358_vm15  ;;  %vm348_vm6 = vcmp.eq.s32.totalorder %v1426_v20, %v1375_v10  ;;  %vm339_vm0 = vcmp.eq.s32.totalorder %v1424_v19, %v1369_v8 }
  0x29   : > { %1192 = vmatpush.bf16.xpose.msk.msra.mxu3 %vm1191_vm7, %v1313_v23  ;;  %vm352_vm7 = vcmp.eq.s32.totalorder %v1426_v20, %v1379_v11  ;;  %vm1099_vm10 = vmpackc.low %vm351_vm5, %vm347_vm4  ;;  %vm341_vm4 = vcmp.eq.s32.totalorder %v1428_v21, %v1369_v8  ;;  %vm345_vm5 = vcmp.eq.s32.totalorder %v1428_v21, %v1372_v9 }
  0x2a   : > { %vm1131_vm13 = vmpackc.low %vm352_vm7, %vm348_vm6  ;;  %vm342_vm7 = vcmp.eq.s32.totalorder %v1430_v22, %v1369_v8 }
  0x2b   : > { %vm1195_vm15 = vmpackc.low %vm354_vm12, %vm350_vm11  ;;  %vm331_vm12 = vcmp.eq.s32.totalorder %v1424_v19, %v1362_v6 }
  0x2e   : > { %1098 = vmatpush.bf16.xpose.msk.msra.mxu0 %vm1097_vm14, %v1313_v23  ;;  %vm1163_vm14 = vmpackc.low %vm353_vm9, %vm349_vm8  ;;  %vm346_vm8 = vcmp.eq.s32.totalorder %v1430_v22, %v1372_v9 }
  0x2f   : > { %1130 = vmatpush.bf16.xpose.msk.msra.mxu1 %vm1129_vm1, %v1313_v23  ;;  %vm343_vm1 = vcmp.eq.s32.totalorder %v1424_v19, %v1372_v9  ;;  %vm1197_vm11 = vmpackc.low %vm346_vm8, %vm342_vm7  ;;  %vm323_vm8 = vcmp.eq.s32.totalorder %v1424_v19, %v1356_v4 }
  0x30   : > { %1162 = vmatpush.bf16.xpose.msk.msra.mxu2 %vm1161_vm2, %v1313_v23  ;;  %vm340_vm2 = vcmp.eq.s32.totalorder %v1426_v20, %v1369_v8  ;;  %vm1101_vm6 = vmpackc.low %vm343_vm1, %vm339_vm0  ;;  %vm333_vm0 = vcmp.eq.s32.totalorder %v1428_v21, %v1362_v6  ;;  %vm337_vm1 = vcmp.eq.s32.totalorder %v1428_v21, %v1366_v7 }
  0x31   : > { %1194 = vmatpush.bf16.xpose.msk.msra.mxu3 %vm1193_vm3, %v1313_v23  ;;  %vm344_vm3 = vcmp.eq.s32.totalorder %v1426_v20, %v1372_v9 }
  0x32   : > { %vm1133_vm9 = vmpackc.low %vm344_vm3, %vm340_vm2  ;;  %vm334_vm3 = vcmp.eq.s32.totalorder %v1430_v22, %v1362_v6 }
  0x36   : > { %1100 = vmatpush.bf16.xpose.msk.msra.mxu0 %vm1099_vm10, %v1313_v23  ;;  %vm1165_vm10 = vmpackc.low %vm345_vm5, %vm341_vm4  ;;  %vm338_vm4 = vcmp.eq.s32.totalorder %v1430_v22, %v1366_v7 }
  0x37   : > { %1132 = vmatpush.bf16.xpose.msk.msra.mxu1 %vm1131_vm13, %v1313_v23  ;;  %vm335_vm13 = vcmp.eq.s32.totalorder %v1424_v19, %v1366_v7  ;;  %vm1199_vm7 = vmpackc.low %vm338_vm4, %vm334_vm3  ;;  %vm315_vm4 = vcmp.eq.s32.totalorder %v1424_v19, %v1348_v2 }
  0x38   : > { %1164 = vmatpush.bf16.xpose.msk.msra.mxu2 %vm1163_vm14, %v1313_v23  ;;  %vm332_vm14 = vcmp.eq.s32.totalorder %v1426_v20, %v1362_v6  ;;  %vm1103_vm2 = vmpackc.low %vm335_vm13, %vm331_vm12  ;;  %vm325_vm12 = vcmp.eq.s32.totalorder %v1428_v21, %v1356_v4  ;;  %vm329_vm13 = vcmp.eq.s32.totalorder %v1428_v21, %v1359_v5 }
  0x39   : > { %1196 = vmatpush.bf16.xpose.msk.msra.mxu3 %vm1195_vm15, %v1313_v23  ;;  %vm336_vm15 = vcmp.eq.s32.totalorder %v1426_v20, %v1366_v7 }
  0x3a   : > { %vm1135_vm5 = vmpackc.low %vm336_vm15, %vm332_vm14  ;;  %vm326_vm15 = vcmp.eq.s32.totalorder %v1430_v22, %v1356_v4 }
  0x3e   : > { %1102 = vmatpush.bf16.xpose.msk.msra.mxu0 %vm1101_vm6, %v1313_v23  ;;  %vm1167_vm6 = vmpackc.low %vm337_vm1, %vm333_vm0  ;;  %vm330_vm0 = vcmp.eq.s32.totalorder %v1430_v22, %v1359_v5 }
  0x3f   : > { %1134 = vmatpush.bf16.xpose.msk.msra.mxu1 %vm1133_vm9, %v1313_v23  ;;  %vm327_vm9 = vcmp.eq.s32.totalorder %v1424_v19, %v1359_v5  ;;  %vm1201_vm3 = vmpackc.low %vm330_vm0, %vm326_vm15  ;;  %vm87_vm0 = vcmp.eq.s32.totalorder %v1592_v25, %v1348_v2 }
  0x40   : > { %1166 = vmatpush.bf16.xpose.msk.msra.mxu2 %vm1165_vm10, %v1313_v23  ;;  %vm324_vm10 = vcmp.eq.s32.totalorder %v1426_v20, %v1356_v4  ;;  %vm1105_vm14 = vmpackc.low %vm327_vm9, %vm323_vm8  ;;  %vm317_vm8 = vcmp.eq.s32.totalorder %v1428_v21, %v1348_v2  ;;  %vm321_vm9 = vcmp.eq.s32.totalorder %v1428_v21, %v1353_v3 }
  0x41   : > { %1198 = vmatpush.bf16.xpose.msk.msra.mxu3 %vm1197_vm11, %v1313_v23  ;;  %vm328_vm11 = vcmp.eq.s32.totalorder %v1426_v20, %v1359_v5 }
  0x42   : > { %vm1137_vm1 = vmpackc.low %vm328_vm11, %vm324_vm10  ;;  %vm318_vm11 = vcmp.eq.s32.totalorder %v1430_v22, %v1348_v2 }
  0x46   : > { %1104 = vmatpush.bf16.xpose.msk.msra.mxu0 %vm1103_vm2, %v1313_v23  ;;  %vm1169_vm2 = vmpackc.low %vm329_vm13, %vm325_vm12  ;;  %vm322_vm12 = vcmp.eq.s32.totalorder %v1430_v22, %v1353_v3 }
  0x47   : > { %1136 = vmatpush.bf16.xpose.msk.msra.mxu1 %vm1135_vm5, %v1313_v23  ;;  %vm319_vm5 = vcmp.eq.s32.totalorder %v1424_v19, %v1353_v3  ;;  %vm1203_vm15 = vmpackc.low %vm322_vm12, %vm318_vm11  ;;  %vm95_vm12 = vcmp.eq.s32.totalorder %v1592_v25, %v1356_v4 }
  0x48   : > { %1168 = vmatpush.bf16.xpose.msk.msra.mxu2 %vm1167_vm6, %v1313_v23  ;;  %vm316_vm6 = vcmp.eq.s32.totalorder %v1426_v20, %v1348_v2  ;;  %vm1107_vm10 = vmpackc.low %vm319_vm5, %vm315_vm4  ;;  %vm89_vm4 = vcmp.eq.s32.totalorder %v1596_v27, %v1348_v2  ;;  %vm93_vm5 = vcmp.eq.s32.totalorder %v1596_v27, %v1353_v3 }
  0x49   : > { %1200 = vmatpush.bf16.xpose.msk.msra.mxu3 %vm1199_vm7, %v1313_v23  ;;  %vm320_vm7 = vcmp.eq.s32.totalorder %v1426_v20, %v1353_v3 }
  0x4a   : > { %vm1139_vm13 = vmpackc.low %vm320_vm7, %vm316_vm6  ;;  %vm90_vm7 = vcmp.eq.s32.totalorder %v1599_v28, %v1348_v2 }
  0x4e   : > { %1106 = vmatpush.bf16.xpose.msk.msra.mxu0 %vm1105_vm14, %v1313_v23  ;;  %vm1171_vm14 = vmpackc.low %vm321_vm9, %vm317_vm8  ;;  %vm94_vm8 = vcmp.eq.s32.totalorder %v1599_v28, %v1353_v3 }
  0x4f   : > { %1138 = vmatpush.bf16.xpose.msk.msra.mxu1 %vm1137_vm1, %v1313_v23  ;;  %vm91_vm1 = vcmp.eq.s32.totalorder %v1592_v25, %v1353_v3  ;;  %vm1205_vm11 = vmpackc.low %vm94_vm8, %vm90_vm7  ;;  %vm103_vm8 = vcmp.eq.s32.totalorder %v1592_v25, %v1362_v6 }
  0x50   : > { %1170 = vmatpush.bf16.xpose.msk.msra.mxu2 %vm1169_vm2, %v1313_v23  ;;  %vm88_vm2 = vcmp.eq.s32.totalorder %v1594_v26, %v1348_v2  ;;  %vm1109_vm6 = vmpackc.low %vm91_vm1, %vm87_vm0  ;;  %vm97_vm0 = vcmp.eq.s32.totalorder %v1596_v27, %v1356_v4  ;;  %vm101_vm1 = vcmp.eq.s32.totalorder %v1596_v27, %v1359_v5 }
  0x51   : > { %1202 = vmatpush.bf16.xpose.msk.msra.mxu3 %vm1201_vm3, %v1313_v23  ;;  %vm92_vm3 = vcmp.eq.s32.totalorder %v1594_v26, %v1353_v3 }
  0x52   : > { %vm1141_vm9 = vmpackc.low %vm92_vm3, %vm88_vm2  ;;  %vm98_vm3 = vcmp.eq.s32.totalorder %v1599_v28, %v1356_v4 }
  0x56   : > { %1108 = vmatpush.bf16.xpose.msk.msra.mxu0 %vm1107_vm10, %v1313_v23  ;;  %vm1173_vm10 = vmpackc.low %vm93_vm5, %vm89_vm4  ;;  %vm102_vm4 = vcmp.eq.s32.totalorder %v1599_v28, %v1359_v5 }
  0x57   : > { %1140 = vmatpush.bf16.xpose.msk.msra.mxu1 %vm1139_vm13, %v1313_v23  ;;  %vm99_vm13 = vcmp.eq.s32.totalorder %v1592_v25, %v1359_v5  ;;  %vm1207_vm7 = vmpackc.low %vm102_vm4, %vm98_vm3  ;;  %vm111_vm4 = vcmp.eq.s32.totalorder %v1592_v25, %v1369_v8 }
  0x58   : > { %1172 = vmatpush.bf16.xpose.msk.msra.mxu2 %vm1171_vm14, %v1313_v23  ;;  %vm96_vm14 = vcmp.eq.s32.totalorder %v1594_v26, %v1356_v4  ;;  %vm1111_vm2 = vmpackc.low %vm99_vm13, %vm95_vm12  ;;  %vm105_vm12 = vcmp.eq.s32.totalorder %v1596_v27, %v1362_v6  ;;  %vm109_vm13 = vcmp.eq.s32.totalorder %v1596_v27, %v1366_v7 }
  0x59   : > { %1204 = vmatpush.bf16.xpose.msk.msra.mxu3 %vm1203_vm15, %v1313_v23  ;;  %vm100_vm15 = vcmp.eq.s32.totalorder %v1594_v26, %v1359_v5 }
  0x5a   : > { %vm1143_vm5 = vmpackc.low %vm100_vm15, %vm96_vm14  ;;  %vm106_vm15 = vcmp.eq.s32.totalorder %v1599_v28, %v1362_v6 }
  0x5d   : > { %1110 = vmatmul.msk.bf16.vlgmr.msra.gmra.mxu0 %vm1109_vm6, %v1313_v23  ;;  %vm1175_vm6 = vmpackc.low %vm101_vm1, %vm97_vm0  ;;  %vm110_vm0 = vcmp.eq.s32.totalorder %v1599_v28, %v1366_v7 }
  0x5e   : > { %1142 = vmatmul.msk.bf16.vlgmr.msra.gmra.mxu1 %vm1141_vm9, %v1313_v23  ;;  %vm107_vm9 = vcmp.eq.s32.totalorder %v1592_v25, %v1366_v7  ;;  %vm1209_vm3 = vmpackc.low %vm110_vm0, %vm106_vm15  ;;  %vm119_vm0 = vcmp.eq.s32.totalorder %v1592_v25, %v1375_v10 }
  0x5f   : > { %1174 = vmatmul.msk.bf16.vlgmr.msra.gmra.mxu2 %vm1173_vm10, %v1313_v23  ;;  %vm104_vm10 = vcmp.eq.s32.totalorder %v1594_v26, %v1362_v6  ;;  %vm1113_vm14 = vmpackc.low %vm107_vm9, %vm103_vm8  ;;  %vm113_vm8 = vcmp.eq.s32.totalorder %v1596_v27, %v1369_v8  ;;  %vm117_vm9 = vcmp.eq.s32.totalorder %v1596_v27, %v1372_v9 }
  0x60   : > { %1206 = vmatmul.msk.bf16.vlgmr.msra.gmra.mxu3 %vm1205_vm11, %v1313_v23  ;;  %vm108_vm11 = vcmp.eq.s32.totalorder %v1594_v26, %v1366_v7 }
  0x61   : > { %vm1145_vm1 = vmpackc.low %vm108_vm11, %vm104_vm10  ;;  %vm114_vm11 = vcmp.eq.s32.totalorder %v1599_v28, %v1369_v8 }
  0x6d   : > { %1112 = vmatmul.msk.bf16.gmra.mxu0 %vm1111_vm2, %v1313_v23  ;;  %vm1177_vm2 = vmpackc.low %vm109_vm13, %vm105_vm12  ;;  %vm118_vm12 = vcmp.eq.s32.totalorder %v1599_v28, %v1372_v9 }
  0x6e   : > { %1144 = vmatmul.msk.bf16.gmra.mxu1 %vm1143_vm5, %v1313_v23  ;;  %vm115_vm5 = vcmp.eq.s32.totalorder %v1592_v25, %v1372_v9  ;;  %vm1211_vm15 = vmpackc.low %vm118_vm12, %vm114_vm11  ;;  %vm127_vm12 = vcmp.eq.s32.totalorder %v1592_v25, %v1382_v12 }
  0x6f   : > { %1176 = vmatmul.msk.bf16.gmra.mxu2 %vm1175_vm6, %v1313_v23  ;;  %vm112_vm6 = vcmp.eq.s32.totalorder %v1594_v26, %v1369_v8  ;;  %vm1115_vm10 = vmpackc.low %vm115_vm5, %vm111_vm4  ;;  %vm121_vm4 = vcmp.eq.s32.totalorder %v1596_v27, %v1375_v10  ;;  %vm125_vm5 = vcmp.eq.s32.totalorder %v1596_v27, %v1379_v11 }
  0x70   : > { %1208 = vmatmul.msk.bf16.gmra.mxu3 %vm1207_vm7, %v1313_v23  ;;  %vm116_vm7 = vcmp.eq.s32.totalorder %v1594_v26, %v1372_v9 }
  0x71   : > { %vm1147_vm13 = vmpackc.low %vm116_vm7, %vm112_vm6  ;;  %vm122_vm7 = vcmp.eq.s32.totalorder %v1599_v28, %v1375_v10 }
  0x7d   : > { %1114 = vmatmul.msk.bf16.gmra.mxu0 %vm1113_vm14, %v1313_v23  ;;  %vm1179_vm14 = vmpackc.low %vm117_vm9, %vm113_vm8  ;;  %vm126_vm8 = vcmp.eq.s32.totalorder %v1599_v28, %v1379_v11 }
  0x7e   : > { %1146 = vmatmul.msk.bf16.gmra.mxu1 %vm1145_vm1, %v1313_v23  ;;  %vm123_vm1 = vcmp.eq.s32.totalorder %v1592_v25, %v1379_v11  ;;  %vm1213_vm11 = vmpackc.low %vm126_vm8, %vm122_vm7  ;;  %vm135_vm8 = vcmp.eq.s32.totalorder %v1592_v25, %v1388_v14 }
  0x7f   : > { %1178 = vmatmul.msk.bf16.gmra.mxu2 %vm1177_vm2, %v1313_v23  ;;  %vm120_vm2 = vcmp.eq.s32.totalorder %v1594_v26, %v1375_v10  ;;  %vm1117_vm6 = vmpackc.low %vm123_vm1, %vm119_vm0  ;;  %vm129_vm0 = vcmp.eq.s32.totalorder %v1596_v27, %v1382_v12  ;;  %vm133_vm1 = vcmp.eq.s32.totalorder %v1596_v27, %v1385_v13 }
  0x80   : > { %1210 = vmatmul.msk.bf16.gmra.mxu3 %vm1209_vm3, %v1313_v23  ;;  %vm124_vm3 = vcmp.eq.s32.totalorder %v1594_v26, %v1379_v11 }
  0x81   : > { %vm1149_vm9 = vmpackc.low %vm124_vm3, %vm120_vm2  ;;  %vm130_vm3 = vcmp.eq.s32.totalorder %v1599_v28, %v1382_v12 }
  0x8d   : > { %1116 = vmatmul.msk.bf16.gmra.mxu0 %vm1115_vm10, %v1313_v23  ;;  %vm1181_vm10 = vmpackc.low %vm125_vm5, %vm121_vm4  ;;  %vm134_vm4 = vcmp.eq.s32.totalorder %v1599_v28, %v1385_v13 }
  0x8e   : > { %1148 = vmatmul.msk.bf16.gmra.mxu1 %vm1147_vm13, %v1313_v23  ;;  %vm131_vm13 = vcmp.eq.s32.totalorder %v1592_v25, %v1385_v13  ;;  %vm1215_vm7 = vmpackc.low %vm134_vm4, %vm130_vm3  ;;  %vm143_vm4 = vcmp.eq.s32.totalorder %v1592_v25, %v1395_v16 }
  0x8f   : > { %1180 = vmatmul.msk.bf16.gmra.mxu2 %vm1179_vm14, %v1313_v23  ;;  %vm128_vm14 = vcmp.eq.s32.totalorder %v1594_v26, %v1382_v12  ;;  %vm1119_vm2 = vmpackc.low %vm131_vm13, %vm127_vm12  ;;  %vm137_vm12 = vcmp.eq.s32.totalorder %v1596_v27, %v1388_v14  ;;  %vm141_vm13 = vcmp.eq.s32.totalorder %v1596_v27, %v1392_v15 }
  0x90   : > { %1212 = vmatmul.msk.bf16.gmra.mxu3 %vm1211_vm15, %v1313_v23  ;;  %vm132_vm15 = vcmp.eq.s32.totalorder %v1594_v26, %v1385_v13 }
  0x91   : > { %vm1151_vm5 = vmpackc.low %vm132_vm15, %vm128_vm14  ;;  %vm138_vm15 = vcmp.eq.s32.totalorder %v1599_v28, %v1388_v14 }
  0x9d   : > { %1118 = vmatmul.msk.bf16.gmra.mxu0 %vm1117_vm6, %v1313_v23  ;;  %vm1183_vm6 = vmpackc.low %vm133_vm1, %vm129_vm0  ;;  %vm142_vm0 = vcmp.eq.s32.totalorder %v1599_v28, %v1392_v15 }
  0x9e   : > { %1150 = vmatmul.msk.bf16.gmra.mxu1 %vm1149_vm9, %v1313_v23  ;;  %vm139_vm9 = vcmp.eq.s32.totalorder %v1592_v25, %v1392_v15  ;;  %vm1217_vm3 = vmpackc.low %vm142_vm0, %vm138_vm15 }
  0x9f   : > { %1182 = vmatmul.msk.bf16.gmra.mxu2 %vm1181_vm10, %v1313_v23  ;;  %vm136_vm10 = vcmp.eq.s32.totalorder %v1594_v26, %v1388_v14  ;;  %vm1121_vm14 = vmpackc.low %vm139_vm9, %vm135_vm8  ;;  %vm145_vm8 = vcmp.eq.s32.totalorder %v1596_v27, %v1395_v16  ;;  %vm149_vm9 = vcmp.eq.s32.totalorder %v1596_v27, %v1398_v17  ;;  %v543_v27 = vld [vmem:[#allocation8 + $0x20] sm:$0xff] }
  0xa0   : > { %1214 = vmatmul.msk.bf16.gmra.mxu3 %vm1213_vm11, %v1313_v23  ;;  %vm140_vm11 = vcmp.eq.s32.totalorder %v1594_v26, %v1392_v15 }
  0xa1   : > { %vm1153_vm1 = vmpackc.low %vm140_vm11, %vm136_vm10  ;;  %vm146_vm11 = vcmp.eq.s32.totalorder %v1599_v28, %v1395_v16 }
  0xad   : > { %1120 = vmatmul.msk.bf16.gmra.mxu0 %vm1119_vm2, %v1313_v23  ;;  %vm1185_vm2 = vmpackc.low %vm141_vm13, %vm137_vm12  ;;  %vm150_vm12 = vcmp.eq.s32.totalorder %v1599_v28, %v1398_v17 }
  0xae   : > { %1152 = vmatmul.msk.bf16.gmra.mxu1 %vm1151_vm5, %v1313_v23  ;;  %vm147_vm5 = vcmp.eq.s32.totalorder %v1592_v25, %v1398_v17  ;;  %vm1219_vm15 = vmpackc.low %vm150_vm12, %vm146_vm11 }
  0xaf   : > { %1184 = vmatmul.msk.bf16.gmra.mxu2 %vm1183_vm6, %v1313_v23  ;;  %vm144_vm6 = vcmp.eq.s32.totalorder %v1594_v26, %v1395_v16  ;;  %vm1123_vm10 = vmpackc.low %vm147_vm5, %vm143_vm4 }
  0xb0   : > { %1216 = vmatmul.msk.bf16.gmra.mxu3 %vm1215_vm7, %v1313_v23  ;;  %vm148_vm7 = vcmp.eq.s32.totalorder %v1594_v26, %v1398_v17 }
  0xb1   : > { %vm1155_vm13 = vmpackc.low %vm148_vm7, %vm144_vm6 }
  0xbd   : > { %1122 = vmatmul.msk.bf16.gmra.mxu0 %vm1121_vm14, %v1313_v23  ;;  %vm1187_vm14 = vmpackc.low %vm149_vm9, %vm145_vm8 }
  0xbe   : > { %1154 = vmatmul.msk.bf16.gmra.mxu1 %vm1153_vm1, %v1313_v23 }
  0xbf   : > { %1186 = vmatmul.msk.bf16.gmra.mxu2 %vm1185_vm2, %v1313_v23 }
  0xc0   : > { %1218 = vmatmul.msk.bf16.gmra.mxu3 %vm1217_vm3, %v1313_v23 }
  0xcd   : > { %1124 = vmatmul.msk.bf16.gmra.mxu0 %vm1123_vm10, %v1313_v23 }
  0xce   : > { %1156 = vmatmul.msk.bf16.gmra.mxu1 %vm1155_vm13, %v1313_v23 }
  0xcf   : > { %1188 = vmatmul.msk.bf16.gmra.mxu2 %vm1187_vm14, %v1313_v23 }
  0xd0   : > { %1220 = vmatmul.msk.bf16.gmra.mxu3 %vm1219_vm15, %v1313_v23 }
  0xda   : > { %v564_v29 = vpop.f32.mrf.mxu0 }
  0xdb   : > { %v613_v30 = vpop.f32.mrf.mxu1 }
  0xdc   : > { %v614_v31 = vadd.f32 %v613_v30, %v564_v29 }
  0xe2   : > { %v662_v32 = vpop.f32.mrf.mxu2  ;;  %v566_v33 = vpop.f32.mrf.mxu0 }
  0xe3   : > { %v663_v34 = vadd.f32 %v662_v32, %v614_v31  ;;  %v711_v35 = vpop.f32.mrf.mxu3  ;;  %v615_v36 = vpop.f32.mrf.mxu1 }
  0xe4   : > { %v616_v40 = vadd.f32 %v615_v36, %v566_v33  ;;  %v544_v36 = vld [vmem:[#allocation8 + $0x28] sm:$0xff] }
  0xe5   : > { %v712_v38 = vadd.f32 %v711_v35, %v663_v34 }
  0xe7   : > { %v751_v39 = vadd.f32 %v712_v38, %v539_v37 }
  0xe9   : > { %767 = vst [vmem:[#allocation8] sm:$0xff] %v751_v39 }
  0xea   : > { %v664_v41 = vpop.f32.mrf.mxu2  ;;  %v569_v42 = vpop.f32.mrf.mxu0 }
  0xeb   : > { %v665_v43 = vadd.f32 %v664_v41, %v616_v40  ;;  %v713_v44 = vpop.f32.mrf.mxu3  ;;  %v618_v45 = vpop.f32.mrf.mxu1 }
  0xec   : > { %v619_v49 = vadd.f32 %v618_v45, %v569_v42  ;;  %v545_v45 = vld [vmem:[#allocation8 + $0x30] sm:$0xff] }
  0xed   : > { %v714_v47 = vadd.f32 %v713_v44, %v665_v43 }
  0xef   : > { %v752_v48 = vadd.f32 %v714_v47, %v540_v46 }
  0xf1   : > { %768 = vst [vmem:[#allocation8 + $0x8] sm:$0xff] %v752_v48 }
  0xf2   : > { %v667_v50 = vpop.f32.mrf.mxu2  ;;  %v571_v51 = vpop.f32.mrf.mxu0 }
  0xf3   : > { %v668_v52 = vadd.f32 %v667_v50, %v619_v49  ;;  %v716_v53 = vpop.f32.mrf.mxu3  ;;  %v620_v54 = vpop.f32.mrf.mxu1 }
  0xf4   : > { %v621_v58 = vadd.f32 %v620_v54, %v571_v51  ;;  %v546_v54 = vld [vmem:[#allocation8 + $0x38] sm:$0xff] }
  0xf5   : > { %v717_v56 = vadd.f32 %v716_v53, %v668_v52 }
  0xf7   : > { %v753_v57 = vadd.f32 %v717_v56, %v541_v55 }
  0xf9   : > { %769 = vst [vmem:[#allocation8 + $0x10] sm:$0xff] %v753_v57 }
  0xfa   : > { %v669_v59 = vpop.f32.mrf.mxu2  ;;  %v574_v60 = vpop.f32.mrf.mxu0 }
  0xfb   : > { %v670_v61 = vadd.f32 %v669_v59, %v621_v58  ;;  %v718_v62 = vpop.f32.mrf.mxu3  ;;  %v623_v63 = vpop.f32.mrf.mxu1 }
  0xfc   : > { %v624_v21 = vadd.f32 %v623_v63, %v574_v60  ;;  %v547_v63 = vld [vmem:[#allocation8 + $0x40] sm:$0xff] }
  0xfd   : > { %v719_v19 = vadd.f32 %v718_v62, %v670_v61 }
  0xff   : > { %v754_v20 = vadd.f32 %v719_v19, %v542_v18 }
 0x101   : > { %770 = vst [vmem:[#allocation8 + $0x18] sm:$0xff] %v754_v20 }
 0x102   : > { %v672_v22 = vpop.f32.mrf.mxu2  ;;  %v576_v23 = vpop.f32.mrf.mxu0 }
 0x103   : > { %v673_v24 = vadd.f32 %v672_v22, %v624_v21  ;;  %v721_v25 = vpop.f32.mrf.mxu3  ;;  %v625_v26 = vpop.f32.mrf.mxu1 }
 0x104   : > { %v626_v30 = vadd.f32 %v625_v26, %v576_v23  ;;  %v548_v26 = vld [vmem:[#allocation8 + $0x48] sm:$0xff] }
 0x105   : > { %v722_v28 = vadd.f32 %v721_v25, %v673_v24 }
 0x107   : > { %v755_v29 = vadd.f32 %v722_v28, %v543_v27 }
 0x109   : > { %771 = vst [vmem:[#allocation8 + $0x20] sm:$0xff] %v755_v29 }
 0x10a   : > { %v674_v31 = vpop.f32.mrf.mxu2  ;;  %v579_v32 = vpop.f32.mrf.mxu0 }
 0x10b   : > { %v675_v33 = vadd.f32 %v674_v31, %v626_v30  ;;  %v723_v34 = vpop.f32.mrf.mxu3  ;;  %v628_v35 = vpop.f32.mrf.mxu1 }
 0x10c   : > { %v629_v39 = vadd.f32 %v628_v35, %v579_v32  ;;  %v549_v35 = vld [vmem:[#allocation8 + $0x50] sm:$0xff] }
 0x10d   : > { %v724_v37 = vadd.f32 %v723_v34, %v675_v33 }
 0x10f   : > { %v756_v38 = vadd.f32 %v724_v37, %v544_v36 }
 0x111   : > { %772 = vst [vmem:[#allocation8 + $0x28] sm:$0xff] %v756_v38 }
 0x112   : > { %v677_v40 = vpop.f32.mrf.mxu2  ;;  %v581_v41 = vpop.f32.mrf.mxu0 }
 0x113   : > { %v678_v42 = vadd.f32 %v677_v40, %v629_v39  ;;  %v726_v43 = vpop.f32.mrf.mxu3  ;;  %v630_v44 = vpop.f32.mrf.mxu1 }
 0x114   : > { %v631_v48 = vadd.f32 %v630_v44, %v581_v41  ;;  %v550_v44 = vld [vmem:[#allocation8 + $0x58] sm:$0xff] }
 0x115   : > { %v727_v46 = vadd.f32 %v726_v43, %v678_v42 }
 0x117   : > { %v757_v47 = vadd.f32 %v727_v46, %v545_v45 }
 0x119   : > { %773 = vst [vmem:[#allocation8 + $0x30] sm:$0xff] %v757_v47 }
 0x11a   : > { %v679_v49 = vpop.f32.mrf.mxu2  ;;  %v584_v50 = vpop.f32.mrf.mxu0 }
 0x11b   : > { %v680_v51 = vadd.f32 %v679_v49, %v631_v48  ;;  %v728_v52 = vpop.f32.mrf.mxu3  ;;  %v633_v53 = vpop.f32.mrf.mxu1 }
 0x11c   : > { %v634_v57 = vadd.f32 %v633_v53, %v584_v50  ;;  %v551_v53 = vld [vmem:[#allocation8 + $0x60] sm:$0xff] }
 0x11d   : > { %v729_v55 = vadd.f32 %v728_v52, %v680_v51 }
 0x11f   : > { %v758_v56 = vadd.f32 %v729_v55, %v546_v54 }
 0x121   : > { %774 = vst [vmem:[#allocation8 + $0x38] sm:$0xff] %v758_v56 }
 0x122   : > { %v682_v58 = vpop.f32.mrf.mxu2  ;;  %v586_v59 = vpop.f32.mrf.mxu0 }
 0x123   : > { %v683_v60 = vadd.f32 %v682_v58, %v634_v57  ;;  %v731_v61 = vpop.f32.mrf.mxu3  ;;  %v635_v62 = vpop.f32.mrf.mxu1 }
 0x124   : > { %v636_v20 = vadd.f32 %v635_v62, %v586_v59 }
 0x125   : > { %v732_v18 = vadd.f32 %v731_v61, %v683_v60  ;;  %v552_v60 = vld [vmem:[#allocation8 + $0x68] sm:$0xff] }
 0x127   : > { %v759_v19 = vadd.f32 %v732_v18, %v547_v63 }
 0x129   : > { %775 = vst [vmem:[#allocation8 + $0x40] sm:$0xff] %v759_v19 }
 0x12a   : > { %v684_v21 = vpop.f32.mrf.mxu2  ;;  %v589_v22 = vpop.f32.mrf.mxu0 }
 0x12b   : > { %v685_v23 = vadd.f32 %v684_v21, %v636_v20  ;;  %v733_v24 = vpop.f32.mrf.mxu3  ;;  %v638_v25 = vpop.f32.mrf.mxu1 }
 0x12c   : > { %v639_v29 = vadd.f32 %v638_v25, %v589_v22 }
 0x12d   : > { %v734_v27 = vadd.f32 %v733_v24, %v685_v23  ;;  %v553_v23 = vld [vmem:[#allocation8 + $0x70] sm:$0xff] }
 0x12f   : > { %v760_v28 = vadd.f32 %v734_v27, %v548_v26 }
 0x131   : > { %776 = vst [vmem:[#allocation8 + $0x48] sm:$0xff] %v760_v28 }
 0x132   : > { %v687_v30 = vpop.f32.mrf.mxu2  ;;  %v591_v31 = vpop.f32.mrf.mxu0 }
 0x133   : > { %v688_v32 = vadd.f32 %v687_v30, %v639_v29  ;;  %v736_v33 = vpop.f32.mrf.mxu3  ;;  %v640_v34 = vpop.f32.mrf.mxu1 }
 0x134   : > { %v641_v38 = vadd.f32 %v640_v34, %v591_v31  ;;  %v554_v31 = vld [vmem:[#allocation8 + $0x78] sm:$0xff] }
 0x135   : > { %v737_v36 = vadd.f32 %v736_v33, %v688_v32 }
 0x137   : > { %v761_v37 = vadd.f32 %v737_v36, %v549_v35 }
 0x139   : > { %777 = vst [vmem:[#allocation8 + $0x50] sm:$0xff] %v761_v37 }
 0x13a   : > { %v689_v39 = vpop.f32.mrf.mxu2  ;;  %v594_v40 = vpop.f32.mrf.mxu0 }
 0x13b   : > { %v690_v41 = vadd.f32 %v689_v39, %v641_v38  ;;  %v738_v42 = vpop.f32.mrf.mxu3  ;;  %v643_v43 = vpop.f32.mrf.mxu1 }
 0x13c   : > { %v644_v47 = vadd.f32 %v643_v43, %v594_v40 }
 0x13d   : > { %v739_v45 = vadd.f32 %v738_v42, %v690_v41 }
 0x13f   : > { %v762_v46 = vadd.f32 %v739_v45, %v550_v44 }
 0x141   : > { %778 = vst [vmem:[#allocation8 + $0x58] sm:$0xff] %v762_v46 }
 0x142   : > { %v692_v48 = vpop.f32.mrf.mxu2  ;;  %v596_v49 = vpop.f32.mrf.mxu0 }
 0x143   : > { %v693_v50 = vadd.f32 %v692_v48, %v644_v47  ;;  %v741_v51 = vpop.f32.mrf.mxu3  ;;  %v645_v52 = vpop.f32.mrf.mxu1 }
 0x144   : > { %v646_v56 = vadd.f32 %v645_v52, %v596_v49 }
 0x145   : > { %v742_v54 = vadd.f32 %v741_v51, %v693_v50 }
 0x147   : > { %v763_v55 = vadd.f32 %v742_v54, %v551_v53 }
 0x149   : > { %779 = vst [vmem:[#allocation8 + $0x60] sm:$0xff] %v763_v55 }
 0x14a   : > { %v694_v57 = vpop.f32.mrf.mxu2  ;;  %v599_v61 = vpop.f32.mrf.mxu0 }
 0x14b   : > { %v695_v58 = vadd.f32 %v694_v57, %v646_v56  ;;  %v743_v59 = vpop.f32.mrf.mxu3  ;;  %v648_v62 = vpop.f32.mrf.mxu1 }
 0x14c   : > { %v649_v19 = vadd.f32 %v648_v62, %v599_v61 }
 0x14d   : > { %v744_v63 = vadd.f32 %v743_v59, %v695_v58 }
 0x14f   : > { %v764_v18 = vadd.f32 %v744_v63, %v552_v60 }
 0x151   : > { %780 = vst [vmem:[#allocation8 + $0x68] sm:$0xff] %v764_v18 }
 0x152   : > { %v697_v20 = vpop.f32.mrf.mxu2  ;;  %v601_v25 = vpop.f32.mrf.mxu0 }
 0x153   : > { %v698_v21 = vadd.f32 %v697_v20, %v649_v19  ;;  %v746_v22 = vpop.f32.mrf.mxu3  ;;  %v650_v26 = vpop.f32.mrf.mxu1 }
 0x154   : > { %v651_v28 = vadd.f32 %v650_v26, %v601_v25 }
 0x155   : > { %v747_v24 = vadd.f32 %v746_v22, %v698_v21 }
 0x157   : > { %v765_v27 = vadd.f32 %v747_v24, %v553_v23 }
 0x159   : > { %781 = vst [vmem:[#allocation8 + $0x70] sm:$0xff] %v765_v27 }
 0x15a   : > { %v699_v29 = vpop.f32.mrf.mxu2 }
 0x15b   : > { %v700_v30 = vadd.f32 %v699_v29, %v651_v28  ;;  %v748_v32 = vpop.f32.mrf.mxu3 }
 0x15d   : > { %v749_v33 = vadd.f32 %v748_v32, %v700_v30  ;;  %72 = sbr.rel (!%p69_p1) target bundleno = 22 (0x16), region = 45 }
 0x15f   : > { %v766_v34 = vadd.f32 %v749_v33, %v554_v31 }
 0x161   : > { %782 = vst [vmem:[#allocation8 + $0x78] sm:$0xff] %v766_v34 }
 0x162 PF:  { %v1771_v35 = vand.u32 127, %v50_v0  ;;  %v789_v36 = vld [vmem:[#allocation8] sm:$0xff]  ;;  %v790_v38 = vld [vmem:[#allocation8 + $0x8] sm:$0xff]  ;;  %v791_v0 = vld [vmem:[#allocation8 + $0x10] sm:$0xff]  ;;  %s1314_s0 = smov [#allocation8]   ;;  %s939_s7 = sshll.u32 %s1837_s4, 4  ;;  %s940_s7 = int_to_ptr.hbm [resolvable:$true] %s939_s7 }
 0x163   :  { %v793_v41 = vld [vmem:[#allocation8 + $0x20] sm:$0xff]  ;;  %v794_v43 = vld [vmem:[#allocation8 + $0x28] sm:$0xff]  ;;  %v795_v44 = vld [vmem:[#allocation8 + $0x30] sm:$0xff]  ;;  %s937_s1 = sshll.u32 %s1314_s0, 4  ;;  %s1315_s8 = smov 128   ;;  %s938_s1 = int_to_ptr.vmem [resolvable:$true] %s937_s1 }
 0x164   :  { %vm805_vm0 = vcmp.eq.s32.totalorder %v1348_v2, %v1771_v35  ;;  %vm806_vm1 = vcmp.eq.s32.totalorder %v1353_v3, %v1771_v35  ;;  %vm807_vm2 = vcmp.eq.s32.totalorder %v1356_v4, %v1771_v35  ;;  %vm808_vm3 = vcmp.eq.s32.totalorder %v1359_v5, %v1771_v35  ;;  %v792_v4 = vld [vmem:[#allocation8 + $0x18] sm:$0xff]  ;;  %v797_v50 = vld [vmem:[#allocation8 + $0x40] sm:$0xff]  ;;  %v799_v56 = vld [vmem:[#allocation8 + $0x50] sm:$0xff]  ;;  %s1316_s9 = smov 8  }
 0x165   :  { %v1221_v37 = vsel %vm805_vm0, 1.0, %v1312_v1  ;;  %v1222_v39 = vsel %vm806_vm1, 1.0, %v1312_v1  ;;  %vm809_vm4 = vcmp.eq.s32.totalorder %v1362_v6, %v1771_v35  ;;  %vm810_vm5 = vcmp.eq.s32.totalorder %v1366_v7, %v1771_v35  ;;  %v796_v48 = vld [vmem:[#allocation8 + $0x38] sm:$0xff]  ;;  %v801_v62 = vld [vmem:[#allocation8 + $0x60] sm:$0xff] }
 0x166   :  { %v1223_v2 = vsel %vm807_vm2, 1.0, %v1312_v1  ;;  %vm811_vm6 = vcmp.eq.s32.totalorder %v1369_v8, %v1771_v35  ;;  %v853_v3 = vadd.f32 %v1221_v37, %v789_v36  ;;  %v1224_v40 = vsel %vm808_vm3, 1.0, %v1312_v1  ;;  %v800_v59 = vld [vmem:[#allocation8 + $0x58] sm:$0xff]  ;;  %v802_v20 = vld [vmem:[#allocation8 + $0x68] sm:$0xff] }
 0x167   :  { %v854_v5 = vadd.f32 %v1222_v39, %v790_v38  ;;  %v1225_v42 = vsel %vm809_vm4, 1.0, %v1312_v1  ;;  %v1226_v6 = vsel %vm810_vm5, 1.0, %v1312_v1  ;;  %vm812_vm7 = vcmp.eq.s32.totalorder %v1372_v9, %v1771_v35  ;;  %v803_v24 = vld [vmem:[#allocation8 + $0x70] sm:$0xff] }
 0x168   :  { %v855_v7 = vadd.f32 %v1223_v2, %v791_v0  ;;  %v1227_v45 = vsel %vm811_vm6, 1.0, %v1312_v1  ;;  %vm813_vm8 = vcmp.eq.s32.totalorder %v1375_v10, %v1771_v35  ;;  %vm814_vm9 = vcmp.eq.s32.totalorder %v1379_v11, %v1771_v35  ;;  %v798_v10 = vld [vmem:[#allocation8 + $0x48] sm:$0xff]  ;;  %v804_v26 = vld [vmem:[#allocation8 + $0x78] sm:$0xff] }
 0x169   :  { %v856_v8 = vadd.f32 %v1224_v40, %v792_v4  ;;  %v857_v46 = vadd.f32 %v1225_v42, %v793_v41  ;;  %v858_v47 = vadd.f32 %v1226_v6, %v794_v43  ;;  %v1228_v49 = vsel %vm812_vm7, 1.0, %v1312_v1 }
 0x16a   :  { %vm815_vm10 = vcmp.eq.s32.totalorder %v1382_v12, %v1771_v35  ;;  %v859_v9 = vadd.f32 %v1227_v45, %v795_v44  ;;  %v1229_v51 = vsel %vm813_vm8, 1.0, %v1312_v1  ;;  %v1230_v52 = vsel %vm814_vm9, 1.0, %v1312_v1 }
 0x16b   :  { %vm816_vm11 = vcmp.eq.s32.totalorder %v1385_v13, %v1771_v35  ;;  %vm817_vm12 = vcmp.eq.s32.totalorder %v1388_v14, %v1771_v35  ;;  %v901_v11 = vmin.f32 %v853_v3, 1.0  ;;  %v902_v53 = vmin.f32 %v854_v5, 1.0 }
 0x16c   :  { %v903_v54 = vmin.f32 %v855_v7, 1.0  ;;  %v860_v55 = vadd.f32 %v1228_v49, %v796_v48  ;;  %v1231_v12 = vsel %vm815_vm10, 1.0, %v1312_v1  ;;  %vm818_vm13 = vcmp.eq.s32.totalorder %v1392_v15, %v1771_v35 }
 0x16d   :  { %v904_v57 = vmin.f32 %v856_v8, 1.0  ;;  %v861_v58 = vadd.f32 %v1229_v51, %v797_v50  ;;  %v1232_v60 = vsel %vm816_vm11, 1.0, %v1312_v1  ;;  %vm819_vm14 = vcmp.eq.s32.totalorder %v1395_v16, %v1771_v35  ;;  %917 = vst [vmem:[#allocation8] sm:$0xff] %v901_v11 }
 0x16e   :  { %v905_v13 = vmin.f32 %v857_v46, 1.0  ;;  %v862_v61 = vadd.f32 %v1230_v52, %v798_v10  ;;  %v1233_v63 = vsel %vm817_vm12, 1.0, %v1312_v1  ;;  %vm820_vm15 = vcmp.eq.s32.totalorder %v1398_v17, %v1771_v35  ;;  %918 = vst [vmem:[#allocation8 + $0x8] sm:$0xff] %v902_v53 }
 0x16f   :  { %v906_v18 = vmin.f32 %v858_v47, 1.0  ;;  %v863_v19 = vadd.f32 %v1231_v12, %v799_v56  ;;  %v1234_v21 = vsel %vm818_vm13, 1.0, %v1312_v1  ;;  %919 = vst [vmem:[#allocation8 + $0x10] sm:$0xff] %v903_v54  ;;  %v907_v22 = vmin.f32 %v859_v9, 1.0 }
 0x170   :  { %v864_v23 = vadd.f32 %v1232_v60, %v800_v59  ;;  %v1235_v14 = vsel %vm819_vm14, 1.0, %v1312_v1  ;;  %920 = vst [vmem:[#allocation8 + $0x18] sm:$0xff] %v904_v57  ;;  %v908_v17 = vmin.f32 %v860_v55, 1.0  ;;  %v865_v25 = vadd.f32 %v1233_v63, %v801_v62 }
 0x171   :  { %v1236_v27 = vsel %vm820_vm15, 1.0, %v1312_v1  ;;  %921 = vst [vmem:[#allocation8 + $0x20] sm:$0xff] %v905_v13  ;;  %v909_v28 = vmin.f32 %v861_v58, 1.0  ;;  %v866_v29 = vadd.f32 %v1234_v21, %v802_v20  ;;  %v910_v15 = vmin.f32 %v862_v61, 1.0 }
 0x172   :  { %922 = vst [vmem:[#allocation8 + $0x28] sm:$0xff] %v906_v18  ;;  %v867_v30 = vadd.f32 %v1235_v14, %v803_v24  ;;  %v911_v31 = vmin.f32 %v863_v19, 1.0  ;;  %v868_v32 = vadd.f32 %v1236_v27, %v804_v26  ;;  %v912_v33 = vmin.f32 %v864_v23, 1.0 }
 0x173   :  { %923 = vst [vmem:[#allocation8 + $0x30] sm:$0xff] %v907_v22  ;;  %v913_v16 = vmin.f32 %v865_v25, 1.0  ;;  %v914_v34 = vmin.f32 %v866_v29, 1.0 }
 0x174   :  { %924 = vst [vmem:[#allocation8 + $0x38] sm:$0xff] %v908_v17  ;;  %v915_v1 = vmin.f32 %v867_v30, 1.0  ;;  %v916_v35 = vmin.f32 %v868_v32, 1.0 }
 0x175   :  { %925 = vst [vmem:[#allocation8 + $0x40] sm:$0xff] %v909_v28 }
 0x176   :  { %926 = vst [vmem:[#allocation8 + $0x48] sm:$0xff] %v910_v15 }
 0x177   :  { %927 = vst [vmem:[#allocation8 + $0x50] sm:$0xff] %v911_v31 }
 0x178   :  { %928 = vst [vmem:[#allocation8 + $0x58] sm:$0xff] %v912_v33 }
 0x179   :  { %929 = vst [vmem:[#allocation8 + $0x60] sm:$0xff] %v913_v16 }
 0x17a   :  { %930 = vst [vmem:[#allocation8 + $0x68] sm:$0xff] %v914_v34 }
 0x17b   :  { %931 = vst [vmem:[#allocation8 + $0x70] sm:$0xff] %v915_v1 }
 0x17c   :  { %932 = vst [vmem:[#allocation8 + $0x78] sm:$0xff] %v916_v35 }
 0x17d   :  { %945 = dma.vmem_to_hbm [thread:$0]  %s938_s1, 2048, %s940_s7, [#allocation7], %s1315_s8, %s1315_s8, %s1316_s9  }
 0x17e   :  { %1305 = dma.done.wait [#allocation7], 2048  }
 0x17f   :  { %1306 = vsyncadd [#allocation7], 4294965248 }
 0x180   :  { %950 = vsyncpa [#allocation6], 1 }
 0x181   :  { %951 = vsyncpa [#allocation7], 1 }

</bundles_post_ra>
